<compile_context>
chip_gen: v6e
topology: v6e:2x2x1
jax: 0.10.0
libtpu: 0.0.40
codegen_flags: <defaults>
</compile_context>

<pallas_src>
import functools

import jax
import jax.numpy as jnp
from jax.experimental import pallas as pl
from jax.experimental.pallas import tpu as pltpu


_LANE = 128        # TPU lane width; class dim padded to a multiple of this.
_MAX_TB = 2048     # max batch-tile rows (VMEM footprint still only a few MiB).


def _round_up(n, m):
    return ((n + m - 1) // m) * m


def _net_kernel(x_ref, w1_ref, b1_ref, w2_ref, b2_ref, mask_ref, out_ref, *,
                function, a):
    """Fused fc1 -> relu -> fc2 -> softmax-variant.

    Block shapes:
      x_ref    [TB, F]      f32  (cast to bf16 in-kernel)
      w1_ref   [F,  H]      bf16
      b1_ref   [1,  H]      f32
      w2_ref   [H,  C_pad]  bf16 (zero-padded class columns)
      b2_ref   [1,  C_pad]  f32  (pad lanes: 0, or -1e30 for 'softmax')
      mask_ref [1,  C_pad]  f32  (1 on valid classes, 0 on padding)
      out_ref  [TB, C_pad]  bf16 (lane-dense; wrapper slices to C)
    """
    # fc1 + ReLU: cast the raw f32 activations to bf16 on otherwise-idle VPU
    # slots right before the MXU, accumulate in f32.
    x = x_ref[...].astype(jnp.bfloat16)
    h = jnp.dot(x, w1_ref[...], preferred_element_type=jnp.float32)
    h = jnp.maximum(h + b1_ref[...], 0.0)                       # [TB, H] f32

    # fc2 over the lane-dense padded class width.
    z = jnp.dot(h.astype(jnp.bfloat16), w2_ref[...],
                preferred_element_type=jnp.float32)
    z = z + b2_ref[...]                                         # [TB, C_pad] f32

    if function == "cons":
        # conservative_softmax: nu_i = 1/((a*z_i)^2 + 1e-20); pos = nu/sum(nu)
        nu = mask_ref[...] * pl.reciprocal((a * z) ** 2 + 1e-20, approx=True)
        denom = jnp.sum(nu, axis=1, keepdims=True)
        pos = nu * pl.reciprocal(denom, approx=True)
    elif function == "softRmax":
        # softRmax: nu_i = 1/sum_j (z_j - e_i_j)^2 + 1e-20 ; pos = nu/sum(nu)
        # One-hot expansion: sum_j (z_j - e_i_j)^2 = sum_j z_j^2 - 2*z_i + 1.
        # Padded z lanes are exactly 0 (zero W2 cols, zero b2), so the full-lane
        # sum of z^2 is already correct without masking.
        sq = jnp.sum(z * z, axis=1, keepdims=True)
        dist = jnp.maximum(sq - 2.0 * z + 1.0, 1e-12)   # f32 cancellation guard
        nu = mask_ref[...] * (pl.reciprocal(dist, approx=True) + 1e-20)
        denom = jnp.sum(nu, axis=1, keepdims=True)
        pos = nu * pl.reciprocal(denom, approx=True)
    else:  # 'softmax' — padded b2 lanes hold -1e30, so exp() underflows to 0.
        m = jnp.max(z, axis=1, keepdims=True)
        e = jnp.exp(z - m)
        denom = jnp.sum(e, axis=1, keepdims=True)
        pos = e * pl.reciprocal(denom, approx=True)

    out_ref[...] = pos.astype(out_ref.dtype)


def prepare_params(w1, b1, w2, b2, function):
    """One-time parameter prep (pad/cast), kept OUT of the per-call path.

    w1: [F, 128], b1: [1, 128], w2: [128, C], b2: [1, C] (f32, [in, out] layout).
    Returns (params tuple, num_classes).
    """
    F, H = w1.shape
    C = w2.shape[1]
    C_pad = max(_LANE, _round_up(C, _LANE))

    w1_b = jnp.asarray(w1, jnp.bfloat16)
    b1_f = jnp.asarray(b1, jnp.float32).reshape(1, H)
    w2_p = jnp.zeros((H, C_pad), jnp.bfloat16).at[:, :C].set(
        jnp.asarray(w2, jnp.bfloat16))
    # For plain softmax, bake the padded-lane mask into the bias (-1e30 -> exp=0);
    # the reciprocal variants need exactly-zero padded logits + the 0/1 mask.
    pad_bias = -1e30 if function == "softmax" else 0.0
    b2_p = jnp.full((1, C_pad), pad_bias, jnp.float32).at[:, :C].set(
        jnp.asarray(b2, jnp.float32).reshape(1, C))
    mask = jnp.zeros((1, C_pad), jnp.float32).at[:, :C].set(1.0)
    return (w1_b, b1_f, w2_p, b2_p, mask), C


@functools.partial(jax.jit, static_argnames=("function", "a", "num_classes"))
def net_forward(x, params, *, function="softRmax", a=0.5, num_classes=4):
    """x: [B, F] f32; params: output of prepare_params(...)."""
    w1_b, b1_f, w2_p, b2_p, mask = params
    B, F = x.shape
    H = w1_b.shape[1]
    C_pad = w2_p.shape[1]

    # Batch tiling: one tile for small batches; otherwise 1-2K-row tiles with at
    # least 2 grid steps so the "parallel" axis shards across both v7x TCs.
    if B <= 512:
        TB = B
    else:
        TB = min(_MAX_TB, _round_up(pl.cdiv(B, 2), 256))
    grid = (pl.cdiv(B, TB),)   # ragged last tile: OOB reads unused, writes dropped

    kernel = functools.partial(_net_kernel, function=function, a=a)

    out = pl.pallas_call(
        kernel,
        out_shape=jax.ShapeDtypeStruct((B, C_pad), jnp.bfloat16),
        grid=grid,
        in_specs=[
            pl.BlockSpec((TB, F), lambda i: (i, 0)),        # x: tiled over batch
            pl.BlockSpec((F, H), lambda i: (0, 0)),         # w1: VMEM-resident
            pl.BlockSpec((1, H), lambda i: (0, 0)),         # b1: VMEM-resident
            pl.BlockSpec((H, C_pad), lambda i: (0, 0)),     # w2: VMEM-resident
            pl.BlockSpec((1, C_pad), lambda i: (0, 0)),     # b2: VMEM-resident
            pl.BlockSpec((1, C_pad), lambda i: (0, 0)),     # class mask
        ],
        out_specs=pl.BlockSpec((TB, C_pad), lambda i: (i, 0)),
        compiler_params=pltpu.CompilerParams(
            dimension_semantics=("parallel",),
        ),
    )(x, w1_b, b1_f, w2_p, b2_p, mask)

    # Only the class dim needs slicing; cast the tiny [B, C] slice back to f32.
    return out[:, :num_classes].astype(jnp.float32)


def _init_linear(key, fan_in, fan_out):
    """PyTorch nn.Linear default init (uniform +-1/sqrt(fan_in)), deterministic."""
    kw, kb = jax.random.split(key)
    bound = 1.0 / jnp.sqrt(jnp.float32(fan_in))
    # Stored as [in, out] (transposed vs torch's [out, in]) for row-major matmul.
    w = jax.random.uniform(kw, (fan_in, fan_out), jnp.float32, -bound, bound)
    b = jax.random.uniform(kb, (1, fan_out), jnp.float32, -bound, bound)
    return w, b


def _reference_forward(x, w1, b1, w2, b2, function, a):
    """Pure-JAX reference mirroring the PyTorch module (same bf16 matmul dtype)."""
    h = jnp.dot(x.astype(jnp.bfloat16), w1.astype(jnp.bfloat16),
                preferred_element_type=jnp.float32) + b1
    h = jnp.maximum(h, 0.0)
    z = jnp.dot(h.astype(jnp.bfloat16), w2.astype(jnp.bfloat16),
                preferred_element_type=jnp.float32) + b2
    C = z.shape[1]
    if function == "cons":
        nu = 1.0 / ((a * z) ** 2 + 1e-20)
        return nu / jnp.sum(nu, axis=1, keepdims=True)
    elif function == "softRmax":
        e = jnp.eye(C, dtype=jnp.float32)
        dist = jnp.sum((z[:, None, :] - e[None, :, :]) ** 2, axis=2)  # [B, C]
        nu = 1.0 / dist + 1e-20
        return nu / jnp.sum(nu, axis=1, keepdims=True)
    else:
        return jax.nn.softmax(z, axis=1)


if __name__ == "__main__":
    # Small, deterministic problem consistent with the module's forward:
    # num_features=32, hidden=128 (fixed by Net), num_classes=4.
    B, F, H, C = 8, 32, 128, 4
    A = 0.5

    key = jax.random.PRNGKey(0)
    kx, k1, k2, kx2 = jax.random.split(key, 4)

    x_small = jax.random.normal(kx, (B, F), jnp.float32)
    w1, b1 = _init_linear(k1, F, H)
    w2, b2 = _init_linear(k2, H, C)

    # Larger batch exercises the multi-tile "parallel" grid + ragged last tile.
    x_big = jax.random.normal(kx2, (600, F), jnp.float32)

    cases = [("softRmax", x_small), ("cons", x_small), ("softmax", x_small),
             ("softRmax", x_big)]

    ok = True
    for fn, xin in cases:
        params, ncls = prepare_params(w1, b1, w2, b2, fn)  # one-time per model
        out = jax.block_until_ready(
            net_forward(xin, params, function=fn, a=A, num_classes=ncls))
        ref = _reference_forward(xin, w1, b1, w2, b2, fn, A)
        # Tolerance accounts for the bf16 output store and EUP approx reciprocals.
        if out.shape != (xin.shape[0], C) or not jnp.allclose(
                out, ref, atol=2e-2, rtol=2e-2):
            ok = False
            err = float(jnp.max(jnp.abs(out - ref)))
            print(f"MISMATCH function={fn} B={xin.shape[0]} max_abs_err={err}")

    if ok:
        print("KERNEL_OK")
</pallas_src>

<mosaic_0001>
module attributes {stable_mosaic.version = 11 : i64} {
  func.func @_net_kernel(%arg0: i32, %arg1: memref<8x32xf32, #tpu.memory_space<vmem>>, %arg2: memref<32x128xbf16, #tpu.memory_space<vmem>>, %arg3: memref<1x128xf32, #tpu.memory_space<vmem>>, %arg4: memref<128x128xbf16, #tpu.memory_space<vmem>>, %arg5: memref<1x128xf32, #tpu.memory_space<vmem>>, %arg6: memref<1x128xf32, #tpu.memory_space<vmem>>, %arg7: memref<8x128xbf16, #tpu.memory_space<vmem>>) attributes {dimension_semantics = [#tpu.dimension_semantics<parallel>], iteration_bounds = array<i64: 1>, scalar_prefetch = 0 : i64, scratch_operands = 0 : i64, tpu.core_type = #tpu.core_type<tc>, window_params = [{transform_indices = @transform_0, window_bounds = array<i64: 8, 32>}, {pipeline_mode = #tpu.pipeline_mode<synchronous>, transform_indices = @transform_1, window_bounds = array<i64: 32, 128>}, {pipeline_mode = #tpu.pipeline_mode<synchronous>, transform_indices = @transform_2, window_bounds = array<i64: 1, 128>}, {pipeline_mode = #tpu.pipeline_mode<synchronous>, transform_indices = @transform_3, window_bounds = array<i64: 128, 128>}, {pipeline_mode = #tpu.pipeline_mode<synchronous>, transform_indices = @transform_4, window_bounds = array<i64: 1, 128>}, {pipeline_mode = #tpu.pipeline_mode<synchronous>, transform_indices = @transform_5, window_bounds = array<i64: 1, 128>}, {transform_indices = @transform_6, window_bounds = array<i64: 8, 128>}]} {
    %c0 = arith.constant 0 : index
    %c0_0 = arith.constant 0 : index
    %0 = vector.load %arg1[%c0, %c0_0] : memref<8x32xf32, #tpu.memory_space<vmem>>, vector<8x32xf32>
    %1 = arith.truncf %0 : vector<8x32xf32> to vector<8x32xbf16>
    %c0_1 = arith.constant 0 : index
    %c0_2 = arith.constant 0 : index
    %2 = vector.load %arg2[%c0_1, %c0_2] : memref<32x128xbf16, #tpu.memory_space<vmem>>, vector<32x128xbf16>
    %cst = arith.constant dense<0.000000e+00> : vector<8x128xf32>
    %3 = tpu.matmul %1, %2, %cst {dimension_numbers = #tpu.dot_dimension_numbers<[1], [0], [0], [1], [0, 0, 1, 1], [], []>} : vector<8x32xbf16>, vector<32x128xbf16>, vector<8x128xf32> -> vector<8x128xf32>
    %c0_3 = arith.constant 0 : index
    %c0_4 = arith.constant 0 : index
    %4 = vector.load %arg3[%c0_3, %c0_4] : memref<1x128xf32, #tpu.memory_space<vmem>>, vector<1x128xf32>
    %5 = vector.broadcast %4 : vector<1x128xf32> to vector<8x128xf32>
    %6 = arith.addf %3, %5 : vector<8x128xf32>
    %cst_5 = arith.constant 0.000000e+00 : f32
    %7 = vector.broadcast %cst_5 : f32 to vector<8x128xf32>
    %8 = arith.maximumf %6, %7 : vector<8x128xf32>
    %9 = arith.truncf %8 : vector<8x128xf32> to vector<8x128xbf16>
    %c0_6 = arith.constant 0 : index
    %c0_7 = arith.constant 0 : index
    %10 = vector.load %arg4[%c0_6, %c0_7] : memref<128x128xbf16, #tpu.memory_space<vmem>>, vector<128x128xbf16>
    %cst_8 = arith.constant dense<0.000000e+00> : vector<8x128xf32>
    %11 = tpu.matmul %9, %10, %cst_8 {dimension_numbers = #tpu.dot_dimension_numbers<[1], [0], [0], [1], [0, 0, 1, 1], [], []>} : vector<8x128xbf16>, vector<128x128xbf16>, vector<8x128xf32> -> vector<8x128xf32>
    %c0_9 = arith.constant 0 : index
    %c0_10 = arith.constant 0 : index
    %12 = vector.load %arg5[%c0_9, %c0_10] : memref<1x128xf32, #tpu.memory_space<vmem>>, vector<1x128xf32>
    %13 = vector.broadcast %12 : vector<1x128xf32> to vector<8x128xf32>
    %14 = arith.addf %11, %13 : vector<8x128xf32>
    %15 = arith.mulf %14, %14 : vector<8x128xf32>
    %cst_11 = arith.constant dense<0.000000e+00> : vector<8xf32>
    %16 = vector.multi_reduction <add>, %15, %cst_11 [1] : vector<8x128xf32> to vector<8xf32>
    %17 = vector.shape_cast %16 : vector<8xf32> to vector<8x1xf32>
    %cst_12 = arith.constant 2.000000e+00 : f32
    %18 = vector.broadcast %cst_12 : f32 to vector<8x128xf32>
    %19 = arith.mulf %18, %14 : vector<8x128xf32>
    %20 = vector.broadcast %17 : vector<8x1xf32> to vector<8x128xf32>
    %21 = arith.subf %20, %19 : vector<8x128xf32>
    %cst_13 = arith.constant 1.000000e+00 : f32
    %22 = vector.broadcast %cst_13 : f32 to vector<8x128xf32>
    %23 = arith.addf %21, %22 : vector<8x128xf32>
    %cst_14 = arith.constant 9.99999996E-13 : f32
    %24 = vector.broadcast %cst_14 : f32 to vector<8x128xf32>
    %25 = arith.maximumf %23, %24 : vector<8x128xf32>
    %c0_15 = arith.constant 0 : index
    %c0_16 = arith.constant 0 : index
    %26 = vector.load %arg6[%c0_15, %c0_16] : memref<1x128xf32, #tpu.memory_space<vmem>>, vector<1x128xf32>
    %27 = tpu.reciprocal %25 {approx = true} : vector<8x128xf32> -> vector<8x128xf32>
    %cst_17 = arith.constant 9.99999968E-21 : f32
    %28 = vector.broadcast %cst_17 : f32 to vector<8x128xf32>
    %29 = arith.addf %27, %28 : vector<8x128xf32>
    %30 = vector.broadcast %26 : vector<1x128xf32> to vector<8x128xf32>
    %31 = arith.mulf %30, %29 : vector<8x128xf32>
    %cst_18 = arith.constant dense<0.000000e+00> : vector<8xf32>
    %32 = vector.multi_reduction <add>, %31, %cst_18 [1] : vector<8x128xf32> to vector<8xf32>
    %33 = vector.shape_cast %32 : vector<8xf32> to vector<8x1xf32>
    %34 = tpu.reciprocal %33 {approx = true} : vector<8x1xf32> -> vector<8x1xf32>
    %35 = vector.broadcast %34 : vector<8x1xf32> to vector<8x128xf32>
    %36 = arith.mulf %31, %35 : vector<8x128xf32>
    %37 = arith.truncf %36 : vector<8x128xf32> to vector<8x128xbf16>
    %c0_19 = arith.constant 0 : index
    %c0_20 = arith.constant 0 : index
    %38 = vector.load %arg7[%c0_19, %c0_20] : memref<8x128xbf16, #tpu.memory_space<vmem>>, vector<8x128xbf16>
    tpu.vector_store %arg7[%c0_19, %c0_20], %37 {strides = array<i32>} : memref<8x128xbf16, #tpu.memory_space<vmem>>, vector<8x128xbf16>,
    return
  }
  func.func @transform_0(%arg0: i32) -> (i32, i32) {
    %c0_i32 = arith.constant 0 : i32
    %c0_i32_0 = arith.constant 0 : i32
    return %arg0, %c0_i32 : i32, i32
  }
  func.func @transform_1(%arg0: i32) -> (i32, i32) {
    %c0_i32 = arith.constant 0 : i32
    %c0_i32_0 = arith.constant 0 : i32
    %c0_i32_1 = arith.constant 0 : i32
    return %c0_i32, %c0_i32_0 : i32, i32
  }
  func.func @transform_2(%arg0: i32) -> (i32, i32) {
    %c0_i32 = arith.constant 0 : i32
    %c0_i32_0 = arith.constant 0 : i32
    %c0_i32_1 = arith.constant 0 : i32
    return %c0_i32, %c0_i32_0 : i32, i32
  }
  func.func @transform_3(%arg0: i32) -> (i32, i32) {
    %c0_i32 = arith.constant 0 : i32
    %c0_i32_0 = arith.constant 0 : i32
    %c0_i32_1 = arith.constant 0 : i32
    return %c0_i32, %c0_i32_0 : i32, i32
  }
  func.func @transform_4(%arg0: i32) -> (i32, i32) {
    %c0_i32 = arith.constant 0 : i32
    %c0_i32_0 = arith.constant 0 : i32
    %c0_i32_1 = arith.constant 0 : i32
    return %c0_i32, %c0_i32_0 : i32, i32
  }
  func.func @transform_5(%arg0: i32) -> (i32, i32) {
    %c0_i32 = arith.constant 0 : i32
    %c0_i32_0 = arith.constant 0 : i32
    %c0_i32_1 = arith.constant 0 : i32
    return %c0_i32, %c0_i32_0 : i32, i32
  }
  func.func @transform_6(%arg0: i32) -> (i32, i32) {
    %c0_i32 = arith.constant 0 : i32
    %c0_i32_0 = arith.constant 0 : i32
    return %arg0, %c0_i32 : i32, i32
  }
}

</mosaic_0001>

<bundles_post_ra>
// kernel: net_forward.1
= control target key start
LH: loop header
LB: loop body
LE: loop exit
PB: predicated region body
PF: predicated region fallthrough
CT: control target
= control target key end

     0   :  { %11 = vsyncpa [#allocation3], 0  ;;  %s476_s0 = inlined_call_operand.hbm [shape: f32[8,32], index: 0, kind: input, shape index: {}]   ;;  %s477_s1 = inlined_call_operand.hbm [shape: bf16[32,128], index: 1, kind: input, shape index: {}]   ;;  %s478_s2 = inlined_call_operand.vmem [shape: f32[1,128], index: 2, kind: input, shape index: {}]   ;;  %s479_s3 = inlined_call_operand.hbm [shape: bf16[128,128], index: 3, kind: input, shape index: {}]   ;;  %s480_s4 = inlined_call_operand.vmem [shape: f32[1,128], index: 4, kind: input, shape index: {}]   ;;  %s481_s5 = inlined_call_operand.vmem [shape: f32[1,128], index: 5, kind: input, shape index: {}]   ;;  %s482_s6 = inlined_call_operand.vmem [shape: bf16[8,128], index: 6, kind: output, shape index: {}]  }
   0x1   :  { %12 = vsyncpa [#allocation5], 0  ;;  %s413_s21 = smov [#allocation4]  }
   0x2   :  { %s28_s22 = sshll.u32 %s413_s21, 4  ;;  %s29_s22 = int_to_ptr.vmem [resolvable:$true] %s28_s22 }
   0x3   :  { %s357_s23 = scalar_lea.vmem %s29_s22, 256  ;;  %p362_p1 = scmp.lt.s32.totalorder %s29_s22, %s29_s22 }
   0x4   :  { %p358_p0 = scmp.ne.s32.totalorder %s29_s22, %s357_s23  ;;  %p363_p2 = scmp.lt.s32.totalorder %s357_s23, %s357_s23 }
   0x6   :  { %p364_p3 = por %p363_p2, %p362_p1 }
   0x8   :  { %p365_p4 = pnand %p364_p3, %p358_p0 }
   0xa   :  { %368 = shalt.err (!%p365_p4)
}
   0xb   :  { %s414_s24 = smov 64   ;;  %s415_s25 = smov 4  }
   0xc   :  { %34 = dma.hbm_to_vmem [thread:$0]  %s477_s1, 256, %s29_s22, [#allocation5], %s414_s24, %s414_s24, %s415_s25  }
   0xd   :  { %s416_s28 = smov [#allocation2]   ;;  %s417_s30 = smov [#allocation6]  }
   0xe   :  { %s19_s29 = sshll.u32 %s416_s28, 4  ;;  %s42_s7 = sshll.u32 %s417_s30, 4  ;;  %s20_s29 = int_to_ptr.vmem [resolvable:$true] %s19_s29  ;;  %s43_s7 = int_to_ptr.vmem [resolvable:$true] %s42_s7 }
   0xf   :  { %s377_s8 = scalar_lea.vmem %s20_s29, 128  ;;  %p382_p6 = scmp.lt.s32.totalorder %s20_s29, %s20_s29 }
  0x10   :  { %p378_p5 = scmp.ne.s32.totalorder %s20_s29, %s377_s8  ;;  %p383_p7 = scmp.lt.s32.totalorder %s377_s8, %s377_s8 }
  0x12   :  { %p384_p8 = por %p383_p7, %p382_p6 }
  0x14   :  { %p385_p9 = pnand %p384_p8, %p378_p5 }
  0x16   :  { %388 = shalt.err (!%p385_p9)
}
  0x17   :  { %22 = dma.hbm_to_vmem [thread:$0]  %s476_s0, 128, %s20_s29, [#allocation3]  }
  0x18   :  { %s397_s11 = scalar_lea.vmem %s43_s7, 1024  ;;  %p402_p11 = scmp.lt.s32.totalorder %s43_s7, %s43_s7 }
  0x19   :  { %p398_p10 = scmp.ne.s32.totalorder %s43_s7, %s397_s11  ;;  %p403_p12 = scmp.lt.s32.totalorder %s397_s11, %s397_s11 }
  0x1b   :  { %p404_p13 = por %p403_p12, %p402_p11 }
  0x1d   :  { %p405_p0 = pnand %p404_p13, %p398_p10 }
  0x1f   :  { %408 = shalt.err (!%p405_p0)
}
  0x20   :  { %48 = dma.hbm_to_vmem [thread:$0]  %s479_s3, 1024, %s43_s7, [#allocation5], %s414_s24, %s414_s24, %s415_s25  }
  0x21   :  { %409 = dma.done.wait [#allocation3], 128  }
  0x22   :  { %410 = vsyncadd [#allocation3], 4294967168 }
  0x23   :  { %411 = dma.done.wait [#allocation5], 1280  }
  0x24   :  { %412 = vsyncadd [#allocation5], 4294966016  ;;  %v418_v0 = vmov 0.0   ;;  %vm419_vm0 = vmmov 0   ;;  %v335_v1 = vld [vmem:[#allocation4 + $0x8] sm:$0xff]   ;;  %v336_v2 = vld [vmem:[#allocation4] sm:$0xff]  }
  0x25   :  { %300 = vmatprep.subr.bf16.mxu0 %v418_v0  ;;  %304 = vmatprep.mubr.msk.bf16.mxu0 %vm419_vm0, %v418_v0  ;;  %v63_v3 = vld [vmem:[#allocation2] sm:$0xff]  ;;  %v337_v4 = vld [vmem:[#allocation6 + $0x38] sm:$0xff]   ;;  %v338_v6 = vld [vmem:[#allocation6 + $0x30] sm:$0xff]   ;;  %vm88_vm1 = vcmask 261120  }
  0x26   :  { %308 = vmatprep.subr.bf16.mxu1 %v418_v0  ;;  %324 = vmatprep.mubr.msk.bf16.mxu1 %vm419_vm0, %v418_v0  ;;  %v64_v5 = vpack.c.bf16 %v63_v3, %v63_v3  ;;  %v339_v7 = vld [vmem:[#allocation6 + $0x28] sm:$0xff]   ;;  %v340_v8 = vld [vmem:[#allocation6 + $0x20] sm:$0xff]   ;;  %v341_v9 = vld [vmem:[#allocation6 + $0x18] sm:$0xff]  }
  0x27   :  { %301 = vmatpush3.bf16.msra.mxu0 %v335_v1  ;;  %309 = vmatpush3.bf16.msra.mxu1 %v337_v4  ;;  %v342_v10 = vld [vmem:[#allocation6 + $0x10] sm:$0xff]   ;;  %v343_v11 = vld [vmem:[#allocation6 + $0x8] sm:$0xff]   ;;  %v344_v12 = vld [vmem:[#allocation6] sm:$0xff]  }
  0x28   :  { %302 = vmatprep.subr.bf16.mxu0 %v418_v0  ;;  %310 = vmatprep.subr.bf16.mxu1 %v418_v0  ;;  %v274_v13 = vld [vmem:[%s478_s2] ss:$0 sm:$0xff] }
  0x29   :  { %v278_v21 = vld [vmem:[%s480_s4] ss:$0 sm:$0xff] }
  0x2a   :  { %v287_v34 = vld [vmem:[%s481_s5] ss:$0 sm:$0xff] }
  0x2b   :  { %303 = vmatpush3.bf16.msra.mxu0 %v336_v2  ;;  %311 = vmatpush3.bf16.msra.mxu1 %v338_v6 }
  0x2c   :  { %312 = vmatprep.subr.bf16.mxu1 %v418_v0 }
  0x2e   :  { %305 = vmatmul.mubr.msk.bf16.vlgmr.msra.gmra.mxu0 %vm88_vm1, %v64_v5 }
  0x2f   :  { %313 = vmatpush3.bf16.msra.mxu1 %v339_v7 }
  0x30   :  { %314 = vmatprep.subr.bf16.mxu1 %v418_v0 }
  0x33   :  { %315 = vmatpush3.bf16.msra.mxu1 %v340_v8 }
  0x34   :  { %316 = vmatprep.subr.bf16.mxu1 %v418_v0 }
  0x37   :  { %317 = vmatpush3.bf16.msra.mxu1 %v341_v9 }
  0x38   :  { %318 = vmatprep.subr.bf16.mxu1 %v418_v0 }
  0x3b   :  { %319 = vmatpush3.bf16.msra.mxu1 %v342_v10 }
  0x3c   :  { %320 = vmatprep.subr.bf16.mxu1 %v418_v0 }
  0x3f   :  { %321 = vmatpush3.bf16.msra.mxu1 %v343_v11 }
  0x40   :  { %322 = vmatprep.subr.bf16.mxu1 %v418_v0 }
  0x43   :  { %323 = vmatpush3.bf16.msra.mxu1 %v344_v12 }
  0xee   :  { %v126_v14 = vpop.f32.mrf.mxu0 }
  0xef   :  { %v127_v15 = vadd.f32 %v274_v13, %v126_v14 }
  0xf0   :  { %v306_v16 = vpop.f32.mrf.mxu0 }
  0xf1   :  { %v132_v17 = vmax.f32 %v127_v15, 0.0 }
  0xf2   :  { %v129_v18 = vpop.f32.mrf.mxu0 }
  0xf3   :  { %v133_v19 = vpack.c.bf16 %v132_v17, %v132_v17 }
  0xf4   :  { %v307_v20 = vpop.f32.mrf.mxu0 }
  0xf5   :  { %325 = vmatmul.mubr.bf16.vlgmr.msra.gmra.mxu1 %v133_v19 }
 0x1b5   :  { %v239_v22 = vpop.f32.mrf.mxu1 }
 0x1b6   :  { %v240_v23 = vadd.f32 %v278_v21, %v239_v22 }
 0x1b7   :  { %v326_v24 = vpop.f32.mrf.mxu1 }
 0x1b8   :  { %v245_v25 = vmul.f32 %v240_v23, %v240_v23  ;;  %v248_v28 = vmul.f32 2.0, %v240_v23 }
 0x1b9   :  { %v242_v26 = vpop.f32.mrf.mxu1 }
 0x1ba   :  { %246 = vadd.xlane.f32.xlu0 %v245_v25 }
 0x1bb   :  { %v327_v27 = vpop.f32.mrf.mxu1 }
 0x243   :  { %v247_v29 = vpop.xlane.xlu0 %246 }
 0x244   :  { %v249_v30 = vsub.f32 %v247_v29, %v248_v28 }
 0x246   :  { %v250_v31 = vadd.f32 1.0, %v249_v30 }
 0x248   :  { %v251_v32 = vmax.f32 %v250_v31, 1e-12 }
 0x24a   :  { %345 = vrcp.f32 %v251_v32 }
 0x257   :  { %v346_v33 = vpop.eup %345 }
 0x258   :  { %v254_v35 = vadd.f32 1e-20, %v346_v33 }
 0x25a   :  { %v261_v36 = vmul.f32 %v287_v34, %v254_v35 }
 0x25c   :  { %262 = vadd.xlane.f32.xlu0 %v261_v36 }
 0x2e5   :  { %v263_v37 = vpop.xlane.xlu0 %262 }
 0x2e6   :  { %347 = vrcp.f32 %v263_v37 }
 0x2f3   :  { %v348_v38 = vpop.eup %347 }
 0x2f4   :  { %v265_v39 = vmul.f32 %v348_v38, %v261_v36 }
 0x2f6   :  { %v266_v40 = vpack.c.bf16 %v265_v39, %v265_v39 }
 0x2f8   :  { %267 = vst [vmem:[%s482_s6] sm:$0xf] %v266_v40 }
 0x2f9   :  { %272 = vsyncpa [#allocation3], 1 }
 0x2fa   :  { %273 = vsyncpa [#allocation5], 1 }

</bundles_post_ra>
